<compile_context>
chip_gen: v6e
topology: v6e:2x2x1
jax: 0.10.0
libtpu: 0.0.40
codegen_flags: <defaults>
</compile_context>

<pallas_src>
import functools

import jax
import jax.numpy as jnp
from jax.experimental import pallas as pl
from jax.experimental.pallas import tpu as pltpu

HIDDEN = 128


def _round_up(x, m):
    return ((x + m - 1) // m) * m


def dqn_kernel(x_ref, w1_ref, b1_ref, w2_ref, b2_ref, w3_ref, b3_ref, o_ref):
    # Hoist bias reads (one broadcast each per tile).
    b1 = b1_ref[...]
    b2 = b2_ref[...]
    b3 = b3_ref[...]

    # fc1 + relu  (K = n_obs, tiny; MXU is nowhere near the bottleneck)
    h1 = jnp.dot(x_ref[...], w1_ref[...], preferred_element_type=jnp.float32)
    h1 = jnp.maximum(h1 + b1, 0.0)
    # fc2 + relu
    h2 = jnp.dot(h1, w2_ref[...], preferred_element_type=jnp.float32)
    h2 = jnp.maximum(h2 + b2, 0.0)
    # fc3 (no activation)
    out = jnp.dot(h2, w3_ref[...], preferred_element_type=jnp.float32)
    o_ref[...] = (out + b3).astype(o_ref.dtype)


@functools.partial(jax.jit, static_argnames=("block_b",))
def dqn_forward(x, w1, b1, w2, b2, w3, b3, *, block_b=4096):
    """x: (B, n_obs). Weights stored as (in, out); biases as (1, out).
    Returns (B, n_actions)."""
    B, n_obs = x.shape
    n_actions = w3.shape[1]
    dt = x.dtype

    # Batch tile: big (amortizes ~0.35 us/step pipeline overhead), multiple of
    # 8, no forced split for small/mid batches (single-TC v5e/v6e).  Large
    # batches naturally produce >= several steps for v7x's two TensorCores.
    eff_block = min(block_b, _round_up(B, 8))
    B_pad = _round_up(B, eff_block)

    # Only pad the batch axis (cheap: feature dim is tiny and un-padded).
    if B_pad != B:
        xp = jnp.zeros((B_pad, n_obs), dt).at[:B, :].set(x)
    else:
        xp = x

    grid = (B_pad // eff_block,)

    flops = 2 * B_pad * (n_obs * HIDDEN + HIDDEN * HIDDEN + HIDDEN * n_actions)
    bytes_accessed = 4 * (
        B_pad * (n_obs + n_actions)
        + n_obs * HIDDEN + HIDDEN * HIDDEN + HIDDEN * n_actions
        + 2 * HIDDEN + n_actions
    )

    out = pl.pallas_call(
        dqn_kernel,
        out_shape=jax.ShapeDtypeStruct((B_pad, n_actions), dt),
        grid_spec=pltpu.PrefetchScalarGridSpec(
            num_scalar_prefetch=0,
            grid=grid,
            in_specs=[
                # x: tile over batch, full (un-padded) feature dim.
                pl.BlockSpec((eff_block, n_obs), lambda i: (i, 0)),
                # weights / biases: full blocks, VMEM-resident across the grid.
                pl.BlockSpec((n_obs, HIDDEN), lambda i: (0, 0)),
                pl.BlockSpec((1, HIDDEN), lambda i: (0, 0)),
                pl.BlockSpec((HIDDEN, HIDDEN), lambda i: (0, 0)),
                pl.BlockSpec((1, HIDDEN), lambda i: (0, 0)),
                pl.BlockSpec((HIDDEN, n_actions), lambda i: (0, 0)),
                pl.BlockSpec((1, n_actions), lambda i: (0, 0)),
            ],
            # Output block covers the full (real) action dim.
            out_specs=pl.BlockSpec((eff_block, n_actions), lambda i: (i, 0)),
        ),
        compiler_params=pltpu.CompilerParams(
            dimension_semantics=("parallel",),
        ),
        cost_estimate=pl.CostEstimate(
            flops=flops, transcendentals=0, bytes_accessed=bytes_accessed
        ),
    )(xp, w1, b1, w2, b2, w3, b3)

    # Only the padded batch rows need slicing off (cheap; no column slice).
    return out[:B, :] if B_pad != B else out


def init_dqn_params(key, n_observations, n_actions, dtype=jnp.float32):
    """Deterministic init mimicking nn.Linear (uniform +/- 1/sqrt(fan_in)).
    Weights stored as (in_features, out_features) = PyTorch weight.T;
    biases pre-reshaped to (1, out_features) so forward does no per-call prep."""
    ks = jax.random.split(key, 6)

    def linear(kw, kb, fan_in, fan_out):
        bound = 1.0 / jnp.sqrt(fan_in)
        w = jax.random.uniform(kw, (fan_in, fan_out), dtype, -bound, bound)
        b = jax.random.uniform(kb, (1, fan_out), dtype, -bound, bound)
        return w, b

    w1, b1 = linear(ks[0], ks[1], n_observations, HIDDEN)
    w2, b2 = linear(ks[2], ks[3], HIDDEN, HIDDEN)
    w3, b3 = linear(ks[4], ks[5], HIDDEN, n_actions)
    return w1, b1, w2, b2, w3, b3


def dqn_reference(x, w1, b1, w2, b2, w3, b3):
    h = jnp.maximum(x @ w1 + b1, 0.0)
    h = jnp.maximum(h @ w2 + b2, 0.0)
    return h @ w3 + b3


if __name__ == "__main__":
    key = jax.random.PRNGKey(0)
    k_param, k_x1, k_x2 = jax.random.split(key, 3)

    n_observations = 4   # e.g. CartPole observation dim
    n_actions = 2        # e.g. CartPole action dim
    params = init_dqn_params(k_param, n_observations, n_actions)

    # Small-shape check (single grid step, no batch padding).
    batch = 8
    x = jax.random.normal(k_x1, (batch, n_observations), jnp.float32)
    out = jax.block_until_ready(dqn_forward(x, *params))
    ref = dqn_reference(x, *params)
    assert out.shape == (batch, n_actions)
    assert jnp.allclose(out, ref, atol=1e-5, rtol=1e-5)

    # Multi-step grid + batch-padding check (B not a multiple of the tile).
    batch2 = 500
    x2 = jax.random.normal(k_x2, (batch2, n_observations), jnp.float32)
    out2 = jax.block_until_ready(dqn_forward(x2, *params, block_b=128))
    ref2 = dqn_reference(x2, *params)
    assert out2.shape == (batch2, n_actions)
    assert jnp.allclose(out2, ref2, atol=1e-5, rtol=1e-5)

    print("KERNEL_OK")
</pallas_src>

<mosaic_0001>
module attributes {stable_mosaic.version = 11 : i64} {
  func.func @dqn_kernel(%arg0: i32, %arg1: memref<8x4xf32, #tpu.memory_space<vmem>>, %arg2: memref<4x128xf32, #tpu.memory_space<vmem>>, %arg3: memref<1x128xf32, #tpu.memory_space<vmem>>, %arg4: memref<128x128xf32, #tpu.memory_space<vmem>>, %arg5: memref<1x128xf32, #tpu.memory_space<vmem>>, %arg6: memref<128x2xf32, #tpu.memory_space<vmem>>, %arg7: memref<1x2xf32, #tpu.memory_space<vmem>>, %arg8: memref<8x2xf32, #tpu.memory_space<vmem>>) attributes {dimension_semantics = [#tpu.dimension_semantics<parallel>], iteration_bounds = array<i64: 1>, scalar_prefetch = 0 : i64, scratch_operands = 0 : i64, tpu.core_type = #tpu.core_type<tc>, window_params = [{transform_indices = @transform_0, window_bounds = array<i64: 8, 4>}, {pipeline_mode = #tpu.pipeline_mode<synchronous>, transform_indices = @transform_1, window_bounds = array<i64: 4, 128>}, {pipeline_mode = #tpu.pipeline_mode<synchronous>, transform_indices = @transform_2, window_bounds = array<i64: 1, 128>}, {pipeline_mode = #tpu.pipeline_mode<synchronous>, transform_indices = @transform_3, window_bounds = array<i64: 128, 128>}, {pipeline_mode = #tpu.pipeline_mode<synchronous>, transform_indices = @transform_4, window_bounds = array<i64: 1, 128>}, {pipeline_mode = #tpu.pipeline_mode<synchronous>, transform_indices = @transform_5, window_bounds = array<i64: 128, 2>}, {pipeline_mode = #tpu.pipeline_mode<synchronous>, transform_indices = @transform_6, window_bounds = array<i64: 1, 2>}, {transform_indices = @transform_7, window_bounds = array<i64: 8, 2>}]} {
    %c0 = arith.constant 0 : index
    %c0_0 = arith.constant 0 : index
    %0 = vector.load %arg3[%c0, %c0_0] : memref<1x128xf32, #tpu.memory_space<vmem>>, vector<1x128xf32>
    %c0_1 = arith.constant 0 : index
    %c0_2 = arith.constant 0 : index
    %1 = vector.load %arg5[%c0_1, %c0_2] : memref<1x128xf32, #tpu.memory_space<vmem>>, vector<1x128xf32>
    %c0_3 = arith.constant 0 : index
    %c0_4 = arith.constant 0 : index
    %2 = vector.load %arg7[%c0_3, %c0_4] : memref<1x2xf32, #tpu.memory_space<vmem>>, vector<1x2xf32>
    %c0_5 = arith.constant 0 : index
    %c0_6 = arith.constant 0 : index
    %3 = vector.load %arg1[%c0_5, %c0_6] : memref<8x4xf32, #tpu.memory_space<vmem>>, vector<8x4xf32>
    %c0_7 = arith.constant 0 : index
    %c0_8 = arith.constant 0 : index
    %4 = vector.load %arg2[%c0_7, %c0_8] : memref<4x128xf32, #tpu.memory_space<vmem>>, vector<4x128xf32>
    %cst = arith.constant dense<0.000000e+00> : vector<8x128xf32>
    %5 = tpu.matmul %3, %4, %cst {dimension_numbers = #tpu.dot_dimension_numbers<[1], [0], [0], [1], [0, 0, 1, 1], [], []>} : vector<8x4xf32>, vector<4x128xf32>, vector<8x128xf32> -> vector<8x128xf32>
    %6 = vector.broadcast %0 : vector<1x128xf32> to vector<8x128xf32>
    %7 = arith.addf %5, %6 : vector<8x128xf32>
    %cst_9 = arith.constant 0.000000e+00 : f32
    %8 = vector.broadcast %cst_9 : f32 to vector<8x128xf32>
    %9 = arith.maximumf %7, %8 : vector<8x128xf32>
    %c0_10 = arith.constant 0 : index
    %c0_11 = arith.constant 0 : index
    %10 = vector.load %arg4[%c0_10, %c0_11] : memref<128x128xf32, #tpu.memory_space<vmem>>, vector<128x128xf32>
    %cst_12 = arith.constant dense<0.000000e+00> : vector<8x128xf32>
    %11 = tpu.matmul %9, %10, %cst_12 {dimension_numbers = #tpu.dot_dimension_numbers<[1], [0], [0], [1], [0, 0, 1, 1], [], []>} : vector<8x128xf32>, vector<128x128xf32>, vector<8x128xf32> -> vector<8x128xf32>
    %12 = vector.broadcast %1 : vector<1x128xf32> to vector<8x128xf32>
    %13 = arith.addf %11, %12 : vector<8x128xf32>
    %cst_13 = arith.constant 0.000000e+00 : f32
    %14 = vector.broadcast %cst_13 : f32 to vector<8x128xf32>
    %15 = arith.maximumf %13, %14 : vector<8x128xf32>
    %c0_14 = arith.constant 0 : index
    %c0_15 = arith.constant 0 : index
    %16 = vector.load %arg6[%c0_14, %c0_15] : memref<128x2xf32, #tpu.memory_space<vmem>>, vector<128x2xf32>
    %cst_16 = arith.constant dense<0.000000e+00> : vector<8x2xf32>
    %17 = tpu.matmul %15, %16, %cst_16 {dimension_numbers = #tpu.dot_dimension_numbers<[1], [0], [0], [1], [0, 0, 1, 1], [], []>} : vector<8x128xf32>, vector<128x2xf32>, vector<8x2xf32> -> vector<8x2xf32>
    %18 = vector.broadcast %2 : vector<1x2xf32> to vector<8x2xf32>
    %19 = arith.addf %17, %18 : vector<8x2xf32>
    %c0_17 = arith.constant 0 : index
    %c0_18 = arith.constant 0 : index
    %20 = vector.load %arg8[%c0_17, %c0_18] : memref<8x2xf32, #tpu.memory_space<vmem>>, vector<8x2xf32>
    tpu.vector_store %arg8[%c0_17, %c0_18], %19 {strides = array<i32>} : memref<8x2xf32, #tpu.memory_space<vmem>>, vector<8x2xf32>,
    return
  }
  func.func @transform_0(%arg0: i32) -> (i32, i32) {
    %c0_i32 = arith.constant 0 : i32
    %c0_i32_0 = arith.constant 0 : i32
    return %arg0, %c0_i32 : i32, i32
  }
  func.func @transform_1(%arg0: i32) -> (i32, i32) {
    %c0_i32 = arith.constant 0 : i32
    %c0_i32_0 = arith.constant 0 : i32
    %c0_i32_1 = arith.constant 0 : i32
    return %c0_i32, %c0_i32_0 : i32, i32
  }
  func.func @transform_2(%arg0: i32) -> (i32, i32) {
    %c0_i32 = arith.constant 0 : i32
    %c0_i32_0 = arith.constant 0 : i32
    %c0_i32_1 = arith.constant 0 : i32
    return %c0_i32, %c0_i32_0 : i32, i32
  }
  func.func @transform_3(%arg0: i32) -> (i32, i32) {
    %c0_i32 = arith.constant 0 : i32
    %c0_i32_0 = arith.constant 0 : i32
    %c0_i32_1 = arith.constant 0 : i32
    return %c0_i32, %c0_i32_0 : i32, i32
  }
  func.func @transform_4(%arg0: i32) -> (i32, i32) {
    %c0_i32 = arith.constant 0 : i32
    %c0_i32_0 = arith.constant 0 : i32
    %c0_i32_1 = arith.constant 0 : i32
    return %c0_i32, %c0_i32_0 : i32, i32
  }
  func.func @transform_5(%arg0: i32) -> (i32, i32) {
    %c0_i32 = arith.constant 0 : i32
    %c0_i32_0 = arith.constant 0 : i32
    %c0_i32_1 = arith.constant 0 : i32
    return %c0_i32, %c0_i32_0 : i32, i32
  }
  func.func @transform_6(%arg0: i32) -> (i32, i32) {
    %c0_i32 = arith.constant 0 : i32
    %c0_i32_0 = arith.constant 0 : i32
    %c0_i32_1 = arith.constant 0 : i32
    return %c0_i32, %c0_i32_0 : i32, i32
  }
  func.func @transform_7(%arg0: i32) -> (i32, i32) {
    %c0_i32 = arith.constant 0 : i32
    %c0_i32_0 = arith.constant 0 : i32
    return %arg0, %c0_i32 : i32, i32
  }
}

</mosaic_0001>

<bundles_post_ra>
// kernel: dqn_forward.1
= control target key start
LH: loop header
LB: loop body
LE: loop exit
PB: predicated region body
PF: predicated region fallthrough
CT: control target
= control target key end

     0   :  { %vm41_vm0 = vcmask 1043456   ;;  %vm37_vm1 = vcmask 31744   ;;  %v425_v0 = vmov 0.0   ;;  %vm426_vm2 = vmmov 0   ;;  %s620_s1 = inlined_call_operand.vmem [shape: f32[4,128], index: 1, kind: input, shape index: {}]   ;;  %s621_s0 = inlined_call_operand.vmem [shape: f32[8,4], index: 0, kind: input, shape index: {}]   ;;  %s622_s3 = inlined_call_operand.vmem [shape: f32[128,128], index: 3, kind: input, shape index: {}]   ;;  %s623_s5 = inlined_call_operand.vmem [shape: f32[128,2], index: 5, kind: input, shape index: {}]   ;;  %s624_s2 = inlined_call_operand.vmem [shape: f32[1,128], index: 2, kind: input, shape index: {}]   ;;  %s625_s4 = inlined_call_operand.vmem [shape: f32[1,128], index: 4, kind: input, shape index: {}]   ;;  %s626_s6 = inlined_call_operand.vmem [shape: f32[1,2], index: 6, kind: input, shape index: {}]   ;;  %s627_s7 = inlined_call_operand.vmem [shape: f32[8,2], index: 7, kind: output, shape index: {}]  }
   0x1   :  { %348 = vmatprep.subr.mxu0 %v425_v0  ;;  %v30_v1 = vld [vmem:[%s620_s1] sm:$0xf]  ;;  %350 = vmatprep.mubr.msk.f32.mxu0 %vm426_vm2, %v425_v0  ;;  %v131_v3 = vld [vmem:[%s622_s3 + $0x78] sm:$0xff]  ;;  %v130_v4 = vld [vmem:[%s622_s3 + $0x70] sm:$0xff]  ;;  %vm301_vm3 = vcmask 15360  }
   0x2   :  { %v29_v2 = vld [vmem:[%s621_s0] sm:$0xff]  ;;  %349 = vmatpush3.msk.msra.mxu0 %vm41_vm0, %v30_v1  ;;  %353 = vmatprep.subr.mxu1 %v425_v0  ;;  %v129_v5 = vld [vmem:[%s622_s3 + $0x68] sm:$0xff]  ;;  %v127_v7 = vld [vmem:[%s622_s3 + $0x58] sm:$0xff] }
   0x3   :  { %351 = vmatmul.mubr.msk.f32.vlgmr.msra.gmra.mxu0 %vm37_vm1, %v29_v2  ;;  %354 = vmatpush3.msra.mxu1 %v131_v3  ;;  %v128_v6 = vld [vmem:[%s622_s3 + $0x60] sm:$0xff]  ;;  %v126_v8 = vld [vmem:[%s622_s3 + $0x50] sm:$0xff]  ;;  %v125_v9 = vld [vmem:[%s622_s3 + $0x48] sm:$0xff] }
   0x4   :  { %355 = vmatprep.subr.mxu1 %v425_v0  ;;  %385 = vmatprep.mubr.msk.f32.mxu1 %vm426_vm2, %v425_v0  ;;  %v124_v10 = vld [vmem:[%s622_s3 + $0x40] sm:$0xff]  ;;  %v123_v11 = vld [vmem:[%s622_s3 + $0x38] sm:$0xff]  ;;  %v122_v12 = vld [vmem:[%s622_s3 + $0x30] sm:$0xff] }
   0x5   :  { %356 = vmatpush3.msra.mxu1 %v130_v4  ;;  %388 = vmatprep.subr.mxu0 %v425_v0  ;;  %v121_v13 = vld [vmem:[%s622_s3 + $0x28] sm:$0xff]  ;;  %v120_v14 = vld [vmem:[%s622_s3 + $0x20] sm:$0xff]  ;;  %v119_v15 = vld [vmem:[%s622_s3 + $0x18] sm:$0xff] }
   0x6   :  { %357 = vmatprep.subr.mxu1 %v425_v0  ;;  %420 = vmatprep.mubr.msk.f32.mxu0 %vm426_vm2, %v425_v0  ;;  %v118_v16 = vld [vmem:[%s622_s3 + $0x10] sm:$0xff]  ;;  %v117_v17 = vld [vmem:[%s622_s3 + $0x8] sm:$0xff]  ;;  %v116_v18 = vld [vmem:[%s622_s3] sm:$0xff] }
   0x7   :  { %358 = vmatpush3.msra.mxu1 %v129_v5  ;;  %v224_v19 = vld [vmem:[%s623_s5 + $0x78] sm:$0xff]  ;;  %v223_v20 = vld [vmem:[%s623_s5 + $0x70] sm:$0xff]  ;;  %v222_v21 = vld [vmem:[%s623_s5 + $0x68] sm:$0xff] }
   0x8   :  { %359 = vmatprep.subr.mxu1 %v425_v0  ;;  %389 = vmatpush3.msra.mxu0 %v224_v19  ;;  %v221_v22 = vld [vmem:[%s623_s5 + $0x60] sm:$0xff]  ;;  %v220_v23 = vld [vmem:[%s623_s5 + $0x58] sm:$0xff]  ;;  %v219_v24 = vld [vmem:[%s623_s5 + $0x50] sm:$0xff] }
   0x9   :  { %360 = vmatpush3.msra.mxu1 %v128_v6  ;;  %390 = vmatprep.subr.mxu0 %v425_v0  ;;  %v218_v25 = vld [vmem:[%s623_s5 + $0x48] sm:$0xff]  ;;  %v217_v26 = vld [vmem:[%s623_s5 + $0x40] sm:$0xff]  ;;  %v216_v27 = vld [vmem:[%s623_s5 + $0x38] sm:$0xff] }
   0xa   :  { %361 = vmatprep.subr.mxu1 %v425_v0  ;;  %391 = vmatpush3.msra.mxu0 %v223_v20  ;;  %v215_v28 = vld [vmem:[%s623_s5 + $0x30] sm:$0xff]  ;;  %v214_v29 = vld [vmem:[%s623_s5 + $0x28] sm:$0xff]  ;;  %v213_v30 = vld [vmem:[%s623_s5 + $0x20] sm:$0xff] }
   0xb   :  { %362 = vmatpush3.msra.mxu1 %v127_v7  ;;  %392 = vmatprep.subr.mxu0 %v425_v0  ;;  %v212_v31 = vld [vmem:[%s623_s5 + $0x18] sm:$0xff]  ;;  %v307_v32 = vld [vmem:[%s624_s2] ss:$0 sm:$0xff]  ;;  %v211_v37 = vld [vmem:[%s623_s5 + $0x10] sm:$0xff] }
   0xc   :  { %363 = vmatprep.subr.mxu1 %v425_v0  ;;  %393 = vmatpush3.msra.mxu0 %v222_v21  ;;  %v210_v38 = vld [vmem:[%s623_s5 + $0x8] sm:$0xff]  ;;  %v209_v39 = vld [vmem:[%s623_s5] sm:$0xff] }
   0xd   :  { %364 = vmatpush3.msra.mxu1 %v126_v8  ;;  %394 = vmatprep.subr.mxu0 %v425_v0  ;;  %v310_v40 = vld [vmem:[%s625_s4] ss:$0 sm:$0xff] }
   0xe   :  { %365 = vmatprep.subr.mxu1 %v425_v0  ;;  %395 = vmatpush3.msra.mxu0 %v221_v22  ;;  %v311_v45 = vld [vmem:[%s626_s6] ss:$0 sm:$0xff] }
   0xf   :  { %366 = vmatpush3.msra.mxu1 %v125_v9  ;;  %396 = vmatprep.subr.mxu0 %v425_v0 }
  0x10   :  { %367 = vmatprep.subr.mxu1 %v425_v0  ;;  %397 = vmatpush3.msra.mxu0 %v220_v23 }
  0x11   :  { %368 = vmatpush3.msra.mxu1 %v124_v10  ;;  %398 = vmatprep.subr.mxu0 %v425_v0 }
  0x12   :  { %369 = vmatprep.subr.mxu1 %v425_v0  ;;  %399 = vmatpush3.msra.mxu0 %v219_v24 }
  0x13   :  { %370 = vmatpush3.msra.mxu1 %v123_v11  ;;  %400 = vmatprep.subr.mxu0 %v425_v0 }
  0x14   :  { %371 = vmatprep.subr.mxu1 %v425_v0  ;;  %401 = vmatpush3.msra.mxu0 %v218_v25 }
  0x15   :  { %372 = vmatpush3.msra.mxu1 %v122_v12  ;;  %402 = vmatprep.subr.mxu0 %v425_v0 }
  0x16   :  { %373 = vmatprep.subr.mxu1 %v425_v0  ;;  %403 = vmatpush3.msra.mxu0 %v217_v26 }
  0x17   :  { %374 = vmatpush3.msra.mxu1 %v121_v13  ;;  %404 = vmatprep.subr.mxu0 %v425_v0 }
  0x18   :  { %375 = vmatprep.subr.mxu1 %v425_v0  ;;  %405 = vmatpush3.msra.mxu0 %v216_v27 }
  0x19   :  { %376 = vmatpush3.msra.mxu1 %v120_v14  ;;  %406 = vmatprep.subr.mxu0 %v425_v0 }
  0x1a   :  { %377 = vmatprep.subr.mxu1 %v425_v0  ;;  %407 = vmatpush3.msra.mxu0 %v215_v28 }
  0x1b   :  { %378 = vmatpush3.msra.mxu1 %v119_v15  ;;  %408 = vmatprep.subr.mxu0 %v425_v0 }
  0x1c   :  { %379 = vmatprep.subr.mxu1 %v425_v0  ;;  %409 = vmatpush3.msra.mxu0 %v214_v29 }
  0x1d   :  { %380 = vmatpush3.msra.mxu1 %v118_v16  ;;  %410 = vmatprep.subr.mxu0 %v425_v0 }
  0x1e   :  { %381 = vmatprep.subr.mxu1 %v425_v0  ;;  %411 = vmatpush3.msra.mxu0 %v213_v30 }
  0x1f   :  { %382 = vmatpush3.msra.mxu1 %v117_v17  ;;  %412 = vmatprep.subr.mxu0 %v425_v0 }
  0x20   :  { %383 = vmatprep.subr.mxu1 %v425_v0  ;;  %413 = vmatpush3.msra.mxu0 %v212_v31 }
  0x21   :  { %384 = vmatpush3.msra.mxu1 %v116_v18  ;;  %414 = vmatprep.subr.mxu0 %v425_v0 }
  0x22   :  { %415 = vmatpush3.msra.mxu0 %v211_v37 }
  0x23   :  { %416 = vmatprep.subr.mxu0 %v425_v0 }
  0x24   :  { %417 = vmatpush3.msra.mxu0 %v210_v38 }
  0x25   :  { %418 = vmatprep.subr.mxu0 %v425_v0 }
  0x26   :  { %419 = vmatpush3.msra.mxu0 %v209_v39 }
  0xc3   :  { %v111_v33 = vpop.f32.mrf.mxu0 }
  0xc4   :  { %v112_v34 = vadd.f32 %v307_v32, %v111_v33 }
  0xc5   :  { %v352_v35 = vpop.f32.mrf.mxu0 }
  0xc6   :  { %v115_v36 = vmax.f32 %v112_v34, 0.0 }
  0xc8   :  { %386 = vmatmul.mubr.f32.vlgmr.msra.gmra.mxu1 %v115_v36 }
 0x188   :  { %v204_v41 = vpop.f32.mrf.mxu1 }
 0x189   :  { %v205_v42 = vadd.f32 %v310_v40, %v204_v41 }
 0x18a   :  { %v387_v43 = vpop.f32.mrf.mxu1 }
 0x18b   :  { %v208_v44 = vmax.f32 %v205_v42, 0.0 }
 0x18d   :  { %421 = vmatmul.mubr.f32.vlgmr.msra.gmra.mxu0 %v208_v44 }
 0x24d   :  { %v297_v46 = vpop.f32.mrf.mxu0 }
 0x24e   :  { %v298_v47 = vadd.f32 %v311_v45, %v297_v46 }
 0x24f   :  { %v422_v48 = vpop.f32.mrf.mxu0 }
 0x250   :  { %302 = vst.msk [vmem:[%s627_s7] sm:$0xff] %vm301_vm3, %v298_v47 }

</bundles_post_ra>
